<compile_context>
chip_gen: v7x
topology: tpu7x:2x2x1
jax: 0.10.0
libtpu: 0.0.40
codegen_flags: <defaults>
</compile_context>

<pallas_src>
import jax
import jax.numpy as jnp
from jax.experimental import pallas as pl
from jax.experimental.pallas import tpu as pltpu

EPS = 1e-5
LANE = 128


# ----------------------------------------------------------------------------
# small helpers
# ----------------------------------------------------------------------------
def _round_up(x, m):
    return (x + m - 1) // m * m


def _pad_axis(x, axis, new_size):
    pad = new_size - x.shape[axis]
    if pad <= 0:
        return x
    widths = [(0, 0)] * x.ndim
    widths[axis] = (0, pad)
    return jnp.pad(x, widths)


def _fold_bn(gamma, beta, mean, var):
    scale = gamma / jnp.sqrt(var + EPS)
    bias = beta - mean * scale
    return scale, bias


def _vmem_capacity_bytes():
    try:
        info = pltpu.get_tpu_info()
        for name in ("vmem_capacity_bytes", "vmem_size_bytes", "vmem_bytes"):
            v = getattr(info, name, None)
            if v:
                return int(v)
    except Exception:
        pass
    return 64 * 1024 * 1024  # conservative (v7x per-TC)


VMEM_CAP = _vmem_capacity_bytes()
VMEM_LIMIT = min(int(VMEM_CAP * 3 // 4), 96 * 1024 * 1024)
_BIG_VMEM = VMEM_CAP >= 96 * 1024 * 1024      # v5e / v6e (128 MiB)
TM_CAP = 1024 if _BIG_VMEM else 512
TN_CAP = 512 if _BIG_VMEM else 256
TK_CAP = 512


def _pick_div_tile(total, cap, unit):
    """Largest multiple of `unit` <= cap dividing `total` (fallback: pad)."""
    t = (min(cap, total) // unit) * unit
    while t >= unit:
        if total % t == 0:
            return t
        t -= unit
    return min(cap, _round_up(total, unit))


def _pick_row_tile(ho, cap=8):
    best = 1
    for t in range(1, min(cap, ho) + 1):
        if ho % t == 0:
            best = t
    return best


# ----------------------------------------------------------------------------
# Fused 1x1 conv: tiled matmul + bias (+ residual) (+ ReLU), K-reduction grid
# ----------------------------------------------------------------------------
def _make_matmul_kernel(has_res: bool, do_relu: bool):
    def kernel(*refs):
        if has_res:
            x_ref, w_ref, b_ref, r_ref, o_ref, acc_ref = refs
        else:
            x_ref, w_ref, b_ref, o_ref, acc_ref = refs
            r_ref = None
        k = pl.program_id(2)

        @pl.when(k == 0)
        def _():
            acc_ref[...] = jnp.zeros_like(acc_ref)

        acc_ref[...] += jnp.dot(
            x_ref[...], w_ref[...], preferred_element_type=jnp.float32
        )

        @pl.when(k == pl.num_programs(2) - 1)
        def _():
            y = acc_ref[...] + b_ref[...]
            if has_res:
                y = y + r_ref[...].astype(jnp.float32)
            if do_relu:
                y = jnp.maximum(y, 0.0)
            o_ref[...] = y.astype(o_ref.dtype)

    return kernel


def fused_matmul_bias(x2d, w, bias, residual=None, do_relu=True,
                      out_dtype=jnp.bfloat16):
    """out = relu?((x2d @ w) + bias (+ residual)); bf16 MXU, f32 accumulation."""
    M, Kp = x2d.shape
    Kp2, Cp = w.shape
    assert Kp == Kp2 and Kp % LANE == 0 and Cp % LANE == 0

    tk = _pick_div_tile(Kp, TK_CAP, LANE)
    tn = _pick_div_tile(Cp, TN_CAP, LANE)
    tm = _pick_div_tile(M, TM_CAP, 8)
    Mp = _round_up(M, tm)

    x2d = _pad_axis(x2d, 0, Mp).astype(jnp.bfloat16)
    w = w.astype(jnp.bfloat16)
    bias2 = bias.reshape(1, Cp).astype(jnp.float32)

    in_specs = [
        pl.BlockSpec((tm, tk), lambda i, j, k: (i, k)),
        pl.BlockSpec((tk, tn), lambda i, j, k: (k, j)),
        pl.BlockSpec((1, tn), lambda i, j, k: (0, j)),
    ]
    args = [x2d, w, bias2]
    if residual is not None:
        assert residual.shape == (M, Cp)
        res = _pad_axis(residual, 0, Mp).astype(jnp.bfloat16)
        in_specs.append(pl.BlockSpec((tm, tn), lambda i, j, k: (i, j)))
        args.append(res)

    out = pl.pallas_call(
        _make_matmul_kernel(residual is not None, do_relu),
        out_shape=jax.ShapeDtypeStruct((Mp, Cp), out_dtype),
        grid_spec=pltpu.PrefetchScalarGridSpec(
            num_scalar_prefetch=0,
            grid=(Mp // tm, Cp // tn, Kp // tk),
            in_specs=in_specs,
            out_specs=pl.BlockSpec((tm, tn), lambda i, j, k: (i, j)),
            scratch_shapes=[pltpu.VMEM((tm, tn), jnp.float32)],
        ),
        compiler_params=pltpu.CompilerParams(
            dimension_semantics=("parallel", "parallel", "arbitrary"),
            vmem_limit_bytes=VMEM_LIMIT,
        ),
    )(*args)
    return out[:M] if Mp != M else out


# ----------------------------------------------------------------------------
# 3x3 conv (pad=1, stride in {1,2}) + bias + ReLU
# grid = (N, row_tiles, cout_tiles); halo rows via extra single-row BlockSpecs;
# stride phases built in-kernel once per row tile; per-column-offset f32 VMEM
# accumulators combined in the epilogue.
# ----------------------------------------------------------------------------
def _make_conv2_kernel(s, th, Wo, Wq8, n_c0, taps):
    def kernel(xm_ref, xh0_ref, xh1_ref, w_ref, b_ref, o_ref, xa_ref, acc_ref):
        co = pl.program_id(2)
        C = xa_ref.shape[-1]

        @pl.when(co == 0)
        def _build_phases():
            xa_ref[...] = jnp.zeros_like(xa_ref)
            xm = xm_ref[0]                       # (th*s, Wpad, C)
            h0 = xh0_ref[0, 0]                   # (Wpad, C)
            h1 = xh1_ref[0, 0]                   # (Wpad, C)
            wpad = xm.shape[1]
            if s == 1:
                nc = min(wpad, Wq8)
                xa_ref[0, 0:th, 0:nc, :] = xm[:, 0:nc, :]
                xa_ref[0, th, 0:nc, :] = h0[0:nc, :]
                xa_ref[0, th + 1, 0:nc, :] = h1[0:nc, :]
            else:                                # s == 2
                wq = wpad // 2
                nc = min(wq, Wq8)
                for q in range(2):
                    xm_q = xm.reshape(th * 2, wq, 2, C)[:, :, q, :]
                    for p in range(2):
                        xm_pq = xm_q.reshape(th, 2, wq, C)[:, p, :, :]
                        xa_ref[p * 2 + q, 0:th, 0:nc, :] = xm_pq[:, 0:nc, :]
                    # halo rows -> phase row `th` (row parity 0 -> h0, 1 -> h1)
                    h0_q = h0.reshape(wq, 2, C)[:, q, :]
                    h1_q = h1.reshape(wq, 2, C)[:, q, :]
                    xa_ref[0 * 2 + q, th, 0:nc, :] = h0_q[0:nc, :]
                    xa_ref[1 * 2 + q, th, 0:nc, :] = h1_q[0:nc, :]

        acc_ref[...] = jnp.zeros_like(acc_ref)
        for t, ph, r0, c0 in taps:
            opnd = xa_ref[ph, r0:r0 + th, :, :].reshape(th * Wq8, C)
            acc_ref[c0] += jnp.dot(opnd, w_ref[t],
                                   preferred_element_type=jnp.float32)

        tn = o_ref.shape[-1]
        y = acc_ref[0].reshape(th, Wq8, tn)[:, 0:Wo, :]
        for c0 in range(1, n_c0):
            y = y + acc_ref[c0].reshape(th, Wq8, tn)[:, c0:c0 + Wo, :]
        y = y + b_ref[...].reshape(1, 1, tn)
        y = jnp.maximum(y, 0.0)
        o_ref[0] = y.astype(o_ref.dtype)

    return kernel


def conv3x3_bn_relu(x_nhwc, w_taps, bias, stride):
    """x_nhwc [N,H,W,Cp] bf16; w_taps [9,Cp,Coutp]; bias [Coutp] f32.
    Returns ([N,Ho,Wo,Coutp] bf16, (Ho, Wo))."""
    N, H, W, Cp = x_nhwc.shape
    Coutp = w_taps.shape[-1]
    s = stride
    Ho = (H - 1) // s + 1
    Wo = (W - 1) // s + 1
    th = _pick_row_tile(Ho)
    row_tiles = Ho // th
    ths = th * s

    Wpad = W + 2
    if s == 2 and Wpad % 2:
        Wpad += 1
    H2p = max((row_tiles + 1) * ths, H + 2)
    xp = jnp.pad(x_nhwc, ((0, 0), (1, H2p - H - 1), (1, Wpad - W - 1), (0, 0)))

    Wq8 = _round_up(Wo + 2, 8)
    n_ph = s * s
    n_c0 = 2 // s + 1
    tn = _pick_div_tile(Coutp, 256, LANE)
    taps = [(kh * 3 + kw, (kh % s) * s + (kw % s), kh // s, kw // s)
            for kh in range(3) for kw in range(3)]

    out = pl.pallas_call(
        _make_conv2_kernel(s, th, Wo, Wq8, n_c0, taps),
        out_shape=jax.ShapeDtypeStruct((N, Ho, Wo, Coutp), jnp.bfloat16),
        grid_spec=pltpu.PrefetchScalarGridSpec(
            num_scalar_prefetch=0,
            grid=(N, row_tiles, Coutp // tn),
            in_specs=[
                pl.BlockSpec((1, ths, Wpad, Cp), lambda n, r, c: (n, r, 0, 0)),
                pl.BlockSpec((1, 1, Wpad, Cp),
                             lambda n, r, c: (n, (r + 1) * ths, 0, 0)),
                pl.BlockSpec((1, 1, Wpad, Cp),
                             lambda n, r, c: (n, (r + 1) * ths + 1, 0, 0)),
                pl.BlockSpec((9, Cp, tn), lambda n, r, c: (0, 0, c)),
                pl.BlockSpec((1, tn), lambda n, r, c: (0, c)),
            ],
            out_specs=pl.BlockSpec((1, th, Wo, tn), lambda n, r, c: (n, r, 0, c)),
            scratch_shapes=[
                pltpu.VMEM((n_ph, th + 2, Wq8, Cp), jnp.bfloat16),
                pltpu.VMEM((n_c0, th * Wq8, tn), jnp.float32),
            ],
        ),
        compiler_params=pltpu.CompilerParams(
            # cout axis kept "arbitrary" so the phase scratch built at co==0
            # stays valid for all cout tiles of a (n, row-tile) group.
            dimension_semantics=("parallel", "parallel", "arbitrary"),
            vmem_limit_bytes=VMEM_LIMIT,
        ),
    )(xp.astype(jnp.bfloat16), xp.astype(jnp.bfloat16), xp.astype(jnp.bfloat16),
      w_taps.astype(jnp.bfloat16), bias.reshape(1, -1).astype(jnp.float32))
    return out, (Ho, Wo)


# ----------------------------------------------------------------------------
# Projection shortcut: strided 1x1 conv + folded BN bias, stride handled
# in-kernel (no XLA strided slice of the activation).
# ----------------------------------------------------------------------------
def _make_shortcut_kernel(s, th, Wo):
    def kernel(x_ref, w_ref, b_ref, o_ref):
        xv = x_ref[0]                             # (th*s, Wsrc, C)
        C = xv.shape[-1]
        if s != 1:
            ws = xv.shape[1]
            xv = xv.reshape(th, s, ws, C)[:, 0, :, :]           # rows ::s
            xv = xv.reshape(th, ws // s, s, C)[:, :, 0, :]      # cols ::s
        xv = xv[:, 0:Wo, :]
        y = jnp.dot(xv.reshape(th * Wo, C), w_ref[...],
                    preferred_element_type=jnp.float32)
        y = y + b_ref[...]
        o_ref[0] = y.reshape(th, Wo, -1).astype(o_ref.dtype)

    return kernel


def shortcut_proj(x_nhwc, w, bias, stride, Ho, Wo):
    N, H, W, Cp = x_nhwc.shape
    s = stride
    th = _pick_row_tile(Ho)
    row_tiles = Ho // th
    Hneed = row_tiles * th * s
    Wneed = W if s == 1 else _round_up(W, s)
    xs = x_nhwc
    if Hneed > H or Wneed > W:
        xs = jnp.pad(xs, ((0, 0), (0, Hneed - H), (0, Wneed - W), (0, 0)))
    Coutp = w.shape[-1]
    tn = _pick_div_tile(Coutp, 256, LANE)

    return pl.pallas_call(
        _make_shortcut_kernel(s, th, Wo),
        out_shape=jax.ShapeDtypeStruct((N, Ho, Wo, Coutp), jnp.bfloat16),
        grid_spec=pltpu.PrefetchScalarGridSpec(
            num_scalar_prefetch=0,
            grid=(N, row_tiles, Coutp // tn),
            in_specs=[
                pl.BlockSpec((1, th * s, Wneed, Cp),
                             lambda n, r, c: (n, r, 0, 0)),
                pl.BlockSpec((Cp, tn), lambda n, r, c: (0, c)),
                pl.BlockSpec((1, tn), lambda n, r, c: (0, c)),
            ],
            out_specs=pl.BlockSpec((1, th, Wo, tn), lambda n, r, c: (n, r, 0, c)),
        ),
        compiler_params=pltpu.CompilerParams(
            dimension_semantics=("parallel", "parallel", "parallel"),
            vmem_limit_bytes=VMEM_LIMIT,
        ),
    )(xs.astype(jnp.bfloat16), w.astype(jnp.bfloat16),
      bias.reshape(1, -1).astype(jnp.float32))


# ----------------------------------------------------------------------------
# parameters and forward pass
# ----------------------------------------------------------------------------
def init_bottleneck_params(key, in_planes, planes, stride=1, expansion=4):
    ks = jax.random.split(key, 8)
    out_planes = expansion * planes

    def conv_w(k, cout, cin, kh, kw):
        fan_in = cin * kh * kw
        return jax.random.normal(k, (cout, cin, kh, kw), jnp.float32) * (
            2.0 / fan_in) ** 0.5

    def bn_p(k, c):
        k1, k2, k3, k4 = jax.random.split(k, 4)
        gamma = 1.0 + 0.1 * jax.random.normal(k1, (c,), jnp.float32)
        beta = 0.1 * jax.random.normal(k2, (c,), jnp.float32)
        mean = 0.1 * jax.random.normal(k3, (c,), jnp.float32)
        var = jax.random.uniform(k4, (c,), jnp.float32, 0.5, 1.5)
        return gamma, beta, mean, var

    p = {
        "w1": conv_w(ks[0], planes, in_planes, 1, 1),
        "bn1": bn_p(ks[1], planes),
        "w2": conv_w(ks[2], planes, planes, 3, 3),
        "bn2": bn_p(ks[3], planes),
        "w3": conv_w(ks[4], out_planes, planes, 1, 1),
        "bn3": bn_p(ks[5], out_planes),
        "stride": stride,
        "has_shortcut": (stride != 1 or in_planes != out_planes),
    }
    if p["has_shortcut"]:
        p["ws"] = conv_w(ks[6], out_planes, in_planes, 1, 1)
        p["bns"] = bn_p(ks[7], out_planes)
    return p


def bottleneck_forward(x_nchw, p):
    """Bottleneck forward. Input/output NCHW (PyTorch convention)."""
    stride = p["stride"]
    N, Cin, H, W = x_nchw.shape
    planes = p["w1"].shape[0]
    out_planes = p["w3"].shape[0]

    Cin_p = _round_up(Cin, LANE)
    pln_p = _round_up(planes, LANE)
    out_p = _round_up(out_planes, LANE)

    # TODO(synk): fold this NCHW->NHWC transpose + channel pad + bf16 cast into
    #             the conv1 kernel's index_map to save one activation HBM pass.
    x = jnp.transpose(x_nchw, (0, 2, 3, 1))
    x = _pad_axis(x, 3, Cin_p).astype(jnp.bfloat16)            # [N,H,W,Cin_p]

    # --- conv1 (1x1) + bn1 + relu -------------------------------------------
    s1, b1 = _fold_bn(*p["bn1"])
    w1 = p["w1"][:, :, 0, 0].T * s1[None, :]
    w1 = _pad_axis(_pad_axis(w1, 0, Cin_p), 1, pln_p)
    b1 = _pad_axis(b1, 0, pln_p)
    o1 = fused_matmul_bias(x.reshape(N * H * W, Cin_p), w1, b1, do_relu=True)
    o1 = o1.reshape(N, H, W, pln_p)

    # --- conv2 (3x3, stride, pad=1) + bn2 + relu ------------------------------
    s2, b2 = _fold_bn(*p["bn2"])
    w2 = jnp.transpose(p["w2"], (2, 3, 1, 0)) * s2[None, None, None, :]
    w2 = w2.reshape(9, planes, planes)
    w2 = _pad_axis(_pad_axis(w2, 1, pln_p), 2, pln_p)
    b2 = _pad_axis(b2, 0, pln_p)
    o2, (Ho, Wo) = conv3x3_bn_relu(o1, w2, b2, stride)          # [N,Ho,Wo,pln_p]

    # --- shortcut --------------------------------------------------------------
    if p["has_shortcut"]:
        ssc, bsc = _fold_bn(*p["bns"])
        wsc = p["ws"][:, :, 0, 0].T * ssc[None, :]
        wsc = _pad_axis(_pad_axis(wsc, 0, Cin_p), 1, out_p)
        bsc = _pad_axis(bsc, 0, out_p)
        sc = shortcut_proj(x, wsc, bsc, stride, Ho, Wo)         # [N,Ho,Wo,out_p]
    else:
        sc = x  # identity: Cin == out_planes => Cin_p == out_p; zero padding

    Mo = N * Ho * Wo
    # --- conv3 (1x1) + bn3 + residual add + relu (fused epilogue), bf16 out ---
    s3, b3 = _fold_bn(*p["bn3"])
    w3 = p["w3"][:, :, 0, 0].T * s3[None, :]
    w3 = _pad_axis(_pad_axis(w3, 0, pln_p), 1, out_p)
    b3 = _pad_axis(b3, 0, out_p)
    o3 = fused_matmul_bias(o2.reshape(Mo, pln_p), w3, b3,
                           residual=sc.reshape(Mo, out_p),
                           do_relu=True, out_dtype=jnp.bfloat16)

    out = o3.reshape(N, Ho, Wo, out_p)[:, :, :, :out_planes]
    # TODO(synk): fuse the channel-slice + NHWC->NCHW transpose into conv3's
    #             out_spec to save the final activation pass.
    return jnp.transpose(out, (0, 3, 1, 2)).astype(jnp.float32)


# ----------------------------------------------------------------------------
# Pure-JAX f32 reference (eval-mode BN semantics)
# ----------------------------------------------------------------------------
def _conv_ref(x, w, stride=1, pad=0):
    return jax.lax.conv_general_dilated(
        x, w, (stride, stride), [(pad, pad), (pad, pad)],
        dimension_numbers=("NCHW", "OIHW", "NCHW"),
    )


def _bn_ref(x, bn):
    gamma, beta, mean, var = bn
    inv = gamma / jnp.sqrt(var + EPS)
    return x * inv[None, :, None, None] + (beta - mean * inv)[None, :, None, None]


def bottleneck_ref(x, p):
    out = jax.nn.relu(_bn_ref(_conv_ref(x, p["w1"]), p["bn1"]))
    out = jax.nn.relu(_bn_ref(_conv_ref(out, p["w2"], p["stride"], 1), p["bn2"]))
    out = _bn_ref(_conv_ref(out, p["w3"]), p["bn3"])
    if p["has_shortcut"]:
        sc = _bn_ref(_conv_ref(x, p["ws"], p["stride"]), p["bns"])
    else:
        sc = x
    return jax.nn.relu(out + sc)


# ----------------------------------------------------------------------------
if __name__ == "__main__":
    key = jax.random.PRNGKey(0)
    k_x, k_p1, k_p2 = jax.random.split(key, 3)

    in_planes, planes = 4, 4
    x = jax.random.normal(k_x, (2, in_planes, 16, 16), jnp.float32)  # NCHW

    ok = True
    for stride, kp in ((1, k_p1), (2, k_p2)):
        params = init_bottleneck_params(kp, in_planes, planes, stride=stride)
        out = jax.block_until_ready(bottleneck_forward(x, params))
        ref = jax.block_until_ready(bottleneck_ref(x, params))
        assert out.shape == ref.shape, (out.shape, ref.shape)
        err = float(jnp.max(jnp.abs(out - ref)))
        # bf16 MXU operands (f32 accumulation): allow a bf16-level tolerance.
        tol = 5e-2 * float(jnp.max(jnp.abs(ref))) + 1e-3
        ok = ok and (err <= tol)

    if ok:
        print("KERNEL_OK")
</pallas_src>

<mosaic_0001>
module attributes {stable_mosaic.version = 11 : i64} {
  func.func @kernel(%arg0: i32, %arg1: i32, %arg2: i32, %arg3: memref<512x128xbf16, #tpu.memory_space<vmem>>, %arg4: memref<128x128xbf16, #tpu.memory_space<vmem>>, %arg5: memref<1x128xf32, #tpu.memory_space<vmem>>, %arg6: memref<512x128xbf16, #tpu.memory_space<vmem>>, %arg7: memref<512x128xf32, #tpu.memory_space<vmem>>) attributes {dimension_semantics = [#tpu.dimension_semantics<parallel>, #tpu.dimension_semantics<parallel>, #tpu.dimension_semantics<arbitrary>], iteration_bounds = array<i64: 1, 1, 1>, scalar_prefetch = 0 : i64, scratch_operands = 1 : i64, tpu.core_type = #tpu.core_type<tc>, window_params = [{transform_indices = @transform_0, window_bounds = array<i64: 512, 128>}, {transform_indices = @transform_1, window_bounds = array<i64: 128, 128>}, {transform_indices = @transform_2, window_bounds = array<i64: 1, 128>}, {transform_indices = @transform_3, window_bounds = array<i64: 512, 128>}]} {
    %c0_i32 = arith.constant 0 : i32
    %0 = arith.cmpi eq, %arg2, %c0_i32 : i32
    %1 = arith.extui %0 : i1 to i32
    %c0_i32_0 = arith.constant 0 : i32
    %2 = arith.cmpi ne, %1, %c0_i32_0 : i32
    scf.if %2 {
      %cst_10 = arith.constant 0.000000e+00 : f32
      %12 = vector.broadcast %cst_10 : f32 to vector<512x128xf32>
      %c0_11 = arith.constant 0 : index
      %c0_12 = arith.constant 0 : index
      %13 = vector.load %arg7[%c0_11, %c0_12] : memref<512x128xf32, #tpu.memory_space<vmem>>, vector<512x128xf32>
      tpu.vector_store %arg7[%c0_11, %c0_12], %12 {strides = array<i32>} : memref<512x128xf32, #tpu.memory_space<vmem>>, vector<512x128xf32>,
    } else {
    }
    %c0 = arith.constant 0 : index
    %c0_1 = arith.constant 0 : index
    %3 = vector.load %arg7[%c0, %c0_1] : memref<512x128xf32, #tpu.memory_space<vmem>>, vector<512x128xf32>
    %c0_2 = arith.constant 0 : index
    %c0_3 = arith.constant 0 : index
    %4 = vector.load %arg3[%c0_2, %c0_3] : memref<512x128xbf16, #tpu.memory_space<vmem>>, vector<512x128xbf16>
    %c0_4 = arith.constant 0 : index
    %c0_5 = arith.constant 0 : index
    %5 = vector.load %arg4[%c0_4, %c0_5] : memref<128x128xbf16, #tpu.memory_space<vmem>>, vector<128x128xbf16>
    %cst = arith.constant dense<0.000000e+00> : vector<512x128xf32>
    %6 = tpu.matmul %4, %5, %cst {dimension_numbers = #tpu.dot_dimension_numbers<[1], [0], [0], [1], [0, 0, 1, 1], [], []>} : vector<512x128xbf16>, vector<128x128xbf16>, vector<512x128xf32> -> vector<512x128xf32>
    %7 = arith.addf %3, %6 : vector<512x128xf32>
    %c0_6 = arith.constant 0 : index
    %c0_7 = arith.constant 0 : index
    %8 = vector.load %arg7[%c0_6, %c0_7] : memref<512x128xf32, #tpu.memory_space<vmem>>, vector<512x128xf32>
    tpu.vector_store %arg7[%c0_6, %c0_7], %7 {strides = array<i32>} : memref<512x128xf32, #tpu.memory_space<vmem>>, vector<512x128xf32>,
    %c0_i32_8 = arith.constant 0 : i32
    %9 = arith.cmpi eq, %arg2, %c0_i32_8 : i32
    %10 = arith.extui %9 : i1 to i32
    %c0_i32_9 = arith.constant 0 : i32
    %11 = arith.cmpi ne, %10, %c0_i32_9 : i32
    scf.if %11 {
      %c0_10 = arith.constant 0 : index
      %c0_11 = arith.constant 0 : index
      %12 = vector.load %arg7[%c0_10, %c0_11] : memref<512x128xf32, #tpu.memory_space<vmem>>, vector<512x128xf32>
      %c0_12 = arith.constant 0 : index
      %c0_13 = arith.constant 0 : index
      %13 = vector.load %arg5[%c0_12, %c0_13] : memref<1x128xf32, #tpu.memory_space<vmem>>, vector<1x128xf32>
      %14 = vector.broadcast %13 : vector<1x128xf32> to vector<512x128xf32>
      %15 = arith.addf %12, %14 : vector<512x128xf32>
      %cst_14 = arith.constant 0.000000e+00 : f32
      %16 = vector.broadcast %cst_14 : f32 to vector<512x128xf32>
      %17 = arith.maximumf %15, %16 : vector<512x128xf32>
      %18 = arith.truncf %17 : vector<512x128xf32> to vector<512x128xbf16>
      %c0_15 = arith.constant 0 : index
      %c0_16 = arith.constant 0 : index
      %19 = vector.load %arg6[%c0_15, %c0_16] : memref<512x128xbf16, #tpu.memory_space<vmem>>, vector<512x128xbf16>
      tpu.vector_store %arg6[%c0_15, %c0_16], %18 {strides = array<i32>} : memref<512x128xbf16, #tpu.memory_space<vmem>>, vector<512x128xbf16>,
    } else {
    }
    return
  }
  func.func @transform_0(%arg0: i32, %arg1: i32, %arg2: i32) -> (i32, i32) {
    %c0_i32 = arith.constant 0 : i32
    return %arg0, %arg2 : i32, i32
  }
  func.func @transform_1(%arg0: i32, %arg1: i32, %arg2: i32) -> (i32, i32) {
    %c0_i32 = arith.constant 0 : i32
    return %arg2, %arg1 : i32, i32
  }
  func.func @transform_2(%arg0: i32, %arg1: i32, %arg2: i32) -> (i32, i32) {
    %c0_i32 = arith.constant 0 : i32
    %c0_i32_0 = arith.constant 0 : i32
    return %c0_i32, %arg1 : i32, i32
  }
  func.func @transform_3(%arg0: i32, %arg1: i32, %arg2: i32) -> (i32, i32) {
    %c0_i32 = arith.constant 0 : i32
    return %arg0, %arg1 : i32, i32
  }
}

</mosaic_0001>

<bundles_post_ra>
// kernel: tpu_custom_call.1
= control target key start
LH: loop header
LB: loop body
LE: loop exit
PB: predicated region body
PF: predicated region fallthrough
CT: control target
= control target key end

     0   :  { %8 = vsyncpa [#allocation4], 0  ;;  %s2205_s0 = inlined_call_operand.hbm [shape: bf16[512,128], index: 0, kind: input, shape index: {}]   ;;  %s2206_s1 = inlined_call_operand.hbm [shape: bf16[128,128], index: 1, kind: input, shape index: {}]   ;;  %s2207_s2 = inlined_call_operand.vmem [shape: f32[1,128], index: 2, kind: input, shape index: {}]   ;;  %s2208_s3 = inlined_call_operand.hbm [shape: bf16[512,128], index: 3, kind: output, shape index: {}]  }
   0x1   :  { %9 = vsyncpa [#allocation7], 0 }
   0x2   :  { %10 = vsyncpa [#allocation5], 0  ;;  %s2066_s12 = smov [#allocation3]   ;;  %s1994_s16 = scalar_lea.hbm %s2205_s0, 4096 }
   0x3   :  { %s16_s13 = sshll.u32 %s2066_s12, 4  ;;  %p1995_p0 = scmp.ne.s32.totalorder %s2205_s0, %s1994_s16  ;;  %s17_s13 = int_to_ptr.vmem [resolvable:$true] %s16_s13 }
   0x4   :  { %p1998_p1 = scmp.lt.u32.totalorder %s1994_s16, %s2205_s0 }
   0x6   :  { %p2000_p2 = pnand %p1998_p1, %p1995_p0 }
   0x8   :  { %2003 = shalt.err (!%p2000_p2)
}
   0x9   :  { %s2004_s21 = scalar_lea.vmem %s17_s13, 4096  ;;  %p2009_p4 = scmp.lt.s32.totalorder %s17_s13, %s17_s13 }
   0xa   :  { %p2005_p3 = scmp.ne.s32.totalorder %s17_s13, %s2004_s21  ;;  %p2010_p5 = scmp.lt.s32.totalorder %s2004_s21, %s2004_s21 }
   0xc   :  { %p2011_p6 = por %p2010_p5, %p2009_p4 }
   0xe   :  { %p2012_p7 = pnand %p2011_p6, %p2005_p3 }
  0x10   :  { %2015 = shalt.err (!%p2012_p7)
}
  0x11   :  { %s2067_s22 = smov 64   ;;  %s2068_s23 = smov 4  }
  0x12   :  { %22 = dma.hbm_to_vmem [thread:$0]  %s2205_s0, 4096, %s17_s13, [#allocation4], %s2067_s22, %s2067_s22, %s2068_s23  }
  0x13   :  { %s2069_s26 = smov [#allocation6]   ;;  %s2016_s30 = scalar_lea.hbm %s2206_s1, 1024 }
  0x14   :  { %s28_s27 = sshll.u32 %s2069_s26, 4  ;;  %p2017_p8 = scmp.ne.s32.totalorder %s2206_s1, %s2016_s30  ;;  %s29_s27 = int_to_ptr.vmem [resolvable:$true] %s28_s27 }
  0x15   :  { %p2020_p9 = scmp.lt.u32.totalorder %s2016_s30, %s2206_s1 }
  0x17   :  { %p2022_p10 = pnand %p2020_p9, %p2017_p8 }
  0x19   :  { %2025 = shalt.err (!%p2022_p10)
}
  0x1a   :  { %s2026_s8 = scalar_lea.vmem %s29_s27, 1024  ;;  %p2031_p12 = scmp.lt.s32.totalorder %s29_s27, %s29_s27 }
  0x1b   :  { %p2027_p11 = scmp.ne.s32.totalorder %s29_s27, %s2026_s8  ;;  %p2032_p13 = scmp.lt.s32.totalorder %s2026_s8, %s2026_s8 }
  0x1d   :  { %p2033_p0 = por %p2032_p13, %p2031_p12 }
  0x1f   :  { %p2034_p1 = pnand %p2033_p0, %p2027_p11 }
  0x21   :  { %2037 = shalt.err (!%p2034_p1)
}
  0x22   :  { %34 = dma.hbm_to_vmem [thread:$0]  %s2206_s1, 1024, %s29_s27, [#allocation7], %s2067_s22, %s2067_s22, %s2068_s23  }
  0x23   :  { %2060 = dma.done.wait [#allocation4], 4096  }
  0x24   :  { %2061 = vsyncadd [#allocation4], 4294963200 }
  0x25   :  { %2062 = dma.done.wait [#allocation7], 1024  }
  0x26   :  { %2063 = vsyncadd [#allocation7], 4294966272  ;;  %v1954_v0 = vld [vmem:[#allocation6] sm:$0xff]   ;;  %v1955_v1 = vld [vmem:[#allocation6 + $0x8] sm:$0xff]  }
  0x27   :  { %1853 = vmatprep.subr.bf16.mxu0 %v1954_v0  ;;  %1933 = vmatprep.subr.bf16.mxu1 %v1954_v0  ;;  %v1956_v2 = vld [vmem:[#allocation6 + $0x10] sm:$0xff]   ;;  %v1957_v3 = vld [vmem:[#allocation6 + $0x18] sm:$0xff]   ;;  %v1962_v4 = vld [vmem:[#allocation3] sm:$0xff]  }
  0x28   :  { %1854 = vmatpush3.bf16.msra.mxu0 %v1954_v0  ;;  %1941 = vmatpush3.bf16.msra.mxu1 %v1954_v0  ;;  %v1963_v5 = vld [vmem:[#allocation3 + $0x80] sm:$0xff]   ;;  %v1959_v7 = vld [vmem:[#allocation6 + $0x28] sm:$0xff]   ;;  %v1960_v8 = vld [vmem:[#allocation6 + $0x30] sm:$0xff]  }
  0x29   :  { %1855 = vmatprep.subr.bf16.mxu0 %v1955_v1  ;;  %1934 = vmatprep.subr.bf16.mxu1 %v1955_v1  ;;  %v1958_v6 = vld [vmem:[#allocation6 + $0x20] sm:$0xff]   ;;  %v1961_v9 = vld [vmem:[#allocation6 + $0x38] sm:$0xff]   ;;  %v1964_v10 = vld [vmem:[#allocation3 + $0x8] sm:$0xff]  }
  0x2a   :  { %1869 = vmatprep.mubr.bf16.mxu0 %v1962_v4  ;;  %1901 = vmatprep.mubr.bf16.mxu1 %v1963_v5  ;;  %v1965_v11 = vld [vmem:[#allocation3 + $0x88] sm:$0xff]   ;;  %v1966_v12 = vld [vmem:[#allocation3 + $0x10] sm:$0xff]   ;;  %v1968_v14 = vld [vmem:[#allocation3 + $0x18] sm:$0xff]  }
  0x2b   :  { %v1967_v13 = vld [vmem:[#allocation3 + $0x90] sm:$0xff]   ;;  %v1969_v15 = vld [vmem:[#allocation3 + $0x98] sm:$0xff]   ;;  %v1970_v16 = vld [vmem:[#allocation3 + $0x20] sm:$0xff]  }
  0x2c   :  { %1856 = vmatpush3.bf16.msra.mxu0 %v1955_v1  ;;  %1942 = vmatpush3.bf16.msra.mxu1 %v1955_v1  ;;  %v1971_v17 = vld [vmem:[#allocation3 + $0xa0] sm:$0xff]   ;;  %v1972_v18 = vld [vmem:[#allocation3 + $0x28] sm:$0xff]   ;;  %v1974_v20 = vld [vmem:[#allocation3 + $0x30] sm:$0xff]  }
  0x2d   :  { %1857 = vmatprep.subr.bf16.mxu0 %v1956_v2  ;;  %1935 = vmatprep.subr.bf16.mxu1 %v1956_v2  ;;  %v1973_v19 = vld [vmem:[#allocation3 + $0xa8] sm:$0xff]   ;;  %v1975_v21 = vld [vmem:[#allocation3 + $0xb0] sm:$0xff]   ;;  %v1976_v22 = vld [vmem:[#allocation3 + $0x38] sm:$0xff]  }
  0x2e   :  { %v1977_v23 = vld [vmem:[#allocation3 + $0xb8] sm:$0xff]   ;;  %v1978_v24 = vld [vmem:[#allocation3 + $0x40] sm:$0xff]   ;;  %v1980_v26 = vld [vmem:[#allocation3 + $0x48] sm:$0xff]  }
  0x2f   :  { %v1979_v25 = vld [vmem:[#allocation3 + $0xc0] sm:$0xff]   ;;  %v1981_v27 = vld [vmem:[#allocation3 + $0xc8] sm:$0xff]   ;;  %v1982_v28 = vld [vmem:[#allocation3 + $0x50] sm:$0xff]  }
  0x30   :  { %1858 = vmatpush3.bf16.msra.mxu0 %v1956_v2  ;;  %1943 = vmatpush3.bf16.msra.mxu1 %v1956_v2  ;;  %v1983_v29 = vld [vmem:[#allocation3 + $0xd0] sm:$0xff]   ;;  %v1984_v30 = vld [vmem:[#allocation3 + $0x58] sm:$0xff]   ;;  %v1986_v32 = vld [vmem:[#allocation3 + $0x60] sm:$0xff]  }
  0x31   :  { %1859 = vmatprep.subr.bf16.mxu0 %v1957_v3  ;;  %1936 = vmatprep.subr.bf16.mxu1 %v1957_v3  ;;  %v1985_v31 = vld [vmem:[#allocation3 + $0xd8] sm:$0xff]   ;;  %v1987_v33 = vld [vmem:[#allocation3 + $0xe0] sm:$0xff]   ;;  %v1988_v34 = vld [vmem:[#allocation3 + $0x68] sm:$0xff]  }
  0x32   :  { %v1989_v35 = vld [vmem:[#allocation3 + $0xe8] sm:$0xff]   ;;  %v1990_v36 = vld [vmem:[#allocation3 + $0x70] sm:$0xff]   ;;  %v1992_v38 = vld [vmem:[#allocation3 + $0x78] sm:$0xff]  }
  0x33   :  { %v1991_v37 = vld [vmem:[#allocation3 + $0xf0] sm:$0xff]   ;;  %v1993_v39 = vld [vmem:[#allocation3 + $0xf8] sm:$0xff]   ;;  %v2124_v40 = vld [vmem:[%s2207_s2] ss:$0 sm:$0xff]  ;;  %s2070_s2 = smov [#allocation8]  }
  0x34   :  { %1860 = vmatpush3.bf16.msra.mxu0 %v1957_v3  ;;  %1944 = vmatpush3.bf16.msra.mxu1 %v1957_v3  ;;  %s1440_s11 = sshll.u32 %s2070_s2, 4  ;;  %s1441_s11 = int_to_ptr.vmem [resolvable:$true] %s1440_s11 }
  0x35   :  { %1861 = vmatprep.subr.bf16.mxu0 %v1958_v6  ;;  %1937 = vmatprep.subr.bf16.mxu1 %v1958_v6  ;;  %s2038_s12 = scalar_lea.vmem %s1441_s11, 4096  ;;  %p2043_p3 = scmp.lt.s32.totalorder %s1441_s11, %s1441_s11 }
  0x36   :  { %p2039_p2 = scmp.ne.s32.totalorder %s1441_s11, %s2038_s12  ;;  %p2044_p4 = scmp.lt.s32.totalorder %s2038_s12, %s2038_s12 }
  0x38   :  { %1862 = vmatpush3.bf16.msra.mxu0 %v1958_v6  ;;  %1945 = vmatpush3.bf16.msra.mxu1 %v1958_v6  ;;  %p2045_p5 = por %p2044_p4, %p2043_p3 }
  0x39   :  { %1863 = vmatprep.subr.bf16.mxu0 %v1959_v7  ;;  %1938 = vmatprep.subr.bf16.mxu1 %v1959_v7 }
  0x3a   :  { %p2046_p6 = pnand %p2045_p5, %p2039_p2 }
  0x3c   :  { %1864 = vmatpush3.bf16.msra.mxu0 %v1959_v7  ;;  %1946 = vmatpush3.bf16.msra.mxu1 %v1959_v7 }
  0x3d   :  { %1865 = vmatprep.subr.bf16.mxu0 %v1960_v8  ;;  %1939 = vmatprep.subr.bf16.mxu1 %v1960_v8 }
  0x40   :  { %1866 = vmatpush3.bf16.msra.mxu0 %v1960_v8  ;;  %1947 = vmatpush3.bf16.msra.mxu1 %v1960_v8 }
  0x41   :  { %1867 = vmatprep.subr.bf16.mxu0 %v1961_v9  ;;  %1940 = vmatprep.subr.bf16.mxu1 %v1961_v9 }
  0x44   :  { %1868 = vmatpush3.bf16.msra.mxu0 %v1961_v9  ;;  %1948 = vmatpush3.bf16.msra.mxu1 %v1961_v9 }
  0x47   :  { %1870 = vmatmul.mubr.bf16.vlgmr.msra.gmra.mrb[0].mxu0 %v1964_v10  ;;  %1902 = vmatmul.mubr.bf16.vlgmr.msra.gmra.mrb[0].mxu1 %v1965_v11 }
  0x48   :  { %1873 = vmatprep.mubr.bf16.mxu0 %v1966_v12  ;;  %1905 = vmatprep.mubr.bf16.mxu1 %v1967_v13 }
  0x4f   :  { %1874 = vmatmul.mubr.bf16.gmra.mrb[4].mxu0 %v1968_v14  ;;  %1906 = vmatmul.mubr.bf16.gmra.mrb[4].mxu1 %v1969_v15 }
  0x50   :  { %1877 = vmatprep.mubr.bf16.mxu0 %v1970_v16  ;;  %1909 = vmatprep.mubr.bf16.mxu1 %v1971_v17 }
  0x57   :  { %1878 = vmatmul.mubr.bf16.gmra.mrb[8].mxu0 %v1972_v18  ;;  %1910 = vmatmul.mubr.bf16.gmra.mrb[8].mxu1 %v1973_v19 }
  0x58   :  { %1881 = vmatprep.mubr.bf16.mxu0 %v1974_v20  ;;  %1913 = vmatprep.mubr.bf16.mxu1 %v1975_v21 }
  0x5f   :  { %1882 = vmatmul.mubr.bf16.gmra.mrb[12].mxu0 %v1976_v22  ;;  %1914 = vmatmul.mubr.bf16.gmra.mrb[12].mxu1 %v1977_v23 }
  0x60   :  { %1885 = vmatprep.mubr.bf16.mxu0 %v1978_v24  ;;  %1917 = vmatprep.mubr.bf16.mxu1 %v1979_v25 }
  0x67   :  { %1886 = vmatmul.mubr.bf16.gmra.mrb[16].mxu0 %v1980_v26  ;;  %1918 = vmatmul.mubr.bf16.gmra.mrb[16].mxu1 %v1981_v27 }
  0x68   :  { %1889 = vmatprep.mubr.bf16.mxu0 %v1982_v28  ;;  %1921 = vmatprep.mubr.bf16.mxu1 %v1983_v29 }
  0x6f   :  { %1890 = vmatmul.mubr.bf16.gmra.mrb[20].mxu0 %v1984_v30  ;;  %1922 = vmatmul.mubr.bf16.gmra.mrb[20].mxu1 %v1985_v31 }
  0x70   :  { %1893 = vmatprep.mubr.bf16.mxu0 %v1986_v32  ;;  %1925 = vmatprep.mubr.bf16.mxu1 %v1987_v33 }
  0x77   :  { %1894 = vmatmul.mubr.bf16.gmra.mrb[24].mxu0 %v1988_v34  ;;  %1926 = vmatmul.mubr.bf16.gmra.mrb[24].mxu1 %v1989_v35 }
  0x78   :  { %1897 = vmatprep.mubr.bf16.mxu0 %v1990_v36  ;;  %1929 = vmatprep.mubr.bf16.mxu1 %v1991_v37 }
  0x7f   :  { %1898 = vmatmul.mubr.bf16.gmra.mrb[28].mxu0 %v1992_v38  ;;  %1930 = vmatmul.mubr.bf16.gmra.mrb[28].mxu1 %v1993_v39 }
 0x11a   :  { %v1871_v41 = vpop.f32.mrb[0].mxu0  ;;  %v1903_v42 = vpop.f32.mrb[0].mxu1 }
 0x11b   :  { %v989_v43 = vadd.f32 %v1871_v41, %v2124_v40  ;;  %v1021_v44 = vadd.f32 %v1903_v42, %v2124_v40  ;;  %v530_v45 = vpop.f32.mrb[1].mxu0  ;;  %v658_v46 = vpop.f32.mrb[1].mxu1 }
 0x11c   :  { %v987_v47 = vadd.f32 %v2124_v40, %v530_v45  ;;  %v1019_v48 = vadd.f32 %v2124_v40, %v658_v46  ;;  %v1872_v49 = vpop.f32.mrb[2].mxu0  ;;  %v1904_v50 = vpop.f32.mrb[2].mxu1 }
 0x11d   :  { %v990_v51 = vadd.f32 %v1872_v49, %v2124_v40  ;;  %v1022_v52 = vadd.f32 %v1904_v50, %v2124_v40  ;;  %v533_v53 = vpop.f32.mrb[3].mxu0  ;;  %v661_v54 = vpop.f32.mrb[3].mxu1  ;;  %v1053_v57 = vmax.f32 %v989_v43, 0.0  ;;  %v1085_v58 = vmax.f32 %v1021_v44, 0.0 }
 0x11e   :  { %v988_v55 = vadd.f32 %v2124_v40, %v533_v53  ;;  %v1020_v56 = vadd.f32 %v2124_v40, %v661_v54  ;;  %v1051_v61 = vmax.f32 %v987_v47, 0.0  ;;  %v1083_v62 = vmax.f32 %v1019_v48, 0.0 }
 0x11f   :  { %v1054_v59 = vmax.f32 %v990_v51, 0.0  ;;  %v1086_v60 = vmax.f32 %v1022_v52, 0.0 }
 0x120   :  { %v1052_v63 = vmax.f32 %v988_v55, 0.0  ;;  %v1084_v0 = vmax.f32 %v1020_v56, 0.0 }
 0x121   :  { %v1630_v1 = vpack.c.bf16 %v1054_v59, %v1053_v57  ;;  %v1710_v2 = vpack.c.bf16 %v1086_v60, %v1085_v58 }
 0x122   :  { %v1625_v3 = vpack.c.bf16 %v1052_v63, %v1051_v61  ;;  %v1705_v4 = vpack.c.bf16 %v1084_v0, %v1083_v62  ;;  %v1875_v5 = vpop.f32.mrb[4].mxu0  ;;  %v1907_v6 = vpop.f32.mrb[4].mxu1 }
 0x123   :  { %1782 = vst [vmem:[#allocation8 + $0x8] sm:$0xff] %v1630_v1   ;;  %1798 = vst [vmem:[#allocation8 + $0x88] sm:$0xff] %v1710_v2   ;;  %v993_v7 = vadd.f32 %v1875_v5, %v2124_v40  ;;  %v1025_v8 = vadd.f32 %v1907_v6, %v2124_v40  ;;  %v546_v9 = vpop.f32.mrb[5].mxu0  ;;  %v674_v10 = vpop.f32.mrb[5].mxu1 }
 0x124   :  { %1626 = vst [vmem:[#allocation8] sm:$0xff] %v1625_v3   ;;  %1797 = vst [vmem:[#allocation8 + $0x80] sm:$0xff] %v1705_v4   ;;  %v991_v11 = vadd.f32 %v2124_v40, %v546_v9  ;;  %v1023_v12 = vadd.f32 %v2124_v40, %v674_v10  ;;  %v1876_v13 = vpop.f32.mrb[6].mxu0  ;;  %v1908_v14 = vpop.f32.mrb[6].mxu1 }
 0x125   :  { %v994_v15 = vadd.f32 %v1876_v13, %v2124_v40  ;;  %v1026_v16 = vadd.f32 %v1908_v14, %v2124_v40  ;;  %v549_v17 = vpop.f32.mrb[7].mxu0  ;;  %v677_v18 = vpop.f32.mrb[7].mxu1  ;;  %v1057_v21 = vmax.f32 %v993_v7, 0.0  ;;  %v1089_v22 = vmax.f32 %v1025_v8, 0.0 }
 0x126   :  { %v992_v19 = vadd.f32 %v2124_v40, %v549_v17  ;;  %v1024_v20 = vadd.f32 %v2124_v40, %v677_v18  ;;  %v1055_v25 = vmax.f32 %v991_v11, 0.0  ;;  %v1087_v26 = vmax.f32 %v1023_v12, 0.0 }
 0x127   :  { %v1058_v23 = vmax.f32 %v994_v15, 0.0  ;;  %v1090_v24 = vmax.f32 %v1026_v16, 0.0 }
 0x128   :  { %v1056_v27 = vmax.f32 %v992_v19, 0.0  ;;  %v1088_v28 = vmax.f32 %v1024_v20, 0.0 }
 0x129   :  { %v1640_v29 = vpack.c.bf16 %v1058_v23, %v1057_v21  ;;  %v1720_v30 = vpack.c.bf16 %v1090_v24, %v1089_v22 }
 0x12a   :  { %v1635_v31 = vpack.c.bf16 %v1056_v27, %v1055_v25  ;;  %v1715_v32 = vpack.c.bf16 %v1088_v28, %v1087_v26  ;;  %v1879_v33 = vpop.f32.mrb[8].mxu0  ;;  %v1911_v34 = vpop.f32.mrb[8].mxu1 }
 0x12b   :  { %1784 = vst [vmem:[#allocation8 + $0x18] sm:$0xff] %v1640_v29   ;;  %1800 = vst [vmem:[#allocation8 + $0x98] sm:$0xff] %v1720_v30   ;;  %v997_v35 = vadd.f32 %v1879_v33, %v2124_v40  ;;  %v1029_v36 = vadd.f32 %v1911_v34, %v2124_v40  ;;  %v562_v37 = vpop.f32.mrb[9].mxu0  ;;  %v690_v38 = vpop.f32.mrb[9].mxu1 }
 0x12c   :  { %1783 = vst [vmem:[#allocation8 + $0x10] sm:$0xff] %v1635_v31   ;;  %1799 = vst [vmem:[#allocation8 + $0x90] sm:$0xff] %v1715_v32   ;;  %v995_v39 = vadd.f32 %v2124_v40, %v562_v37  ;;  %v1027_v41 = vadd.f32 %v2124_v40, %v690_v38  ;;  %v1880_v42 = vpop.f32.mrb[10].mxu0  ;;  %v1912_v43 = vpop.f32.mrb[10].mxu1 }
 0x12d   :  { %v998_v44 = vadd.f32 %v1880_v42, %v2124_v40  ;;  %v1030_v45 = vadd.f32 %v1912_v43, %v2124_v40  ;;  %v565_v46 = vpop.f32.mrb[11].mxu0  ;;  %v693_v47 = vpop.f32.mrb[11].mxu1  ;;  %v1061_v50 = vmax.f32 %v997_v35, 0.0  ;;  %v1093_v51 = vmax.f32 %v1029_v36, 0.0 }
 0x12e   :  { %v996_v48 = vadd.f32 %v2124_v40, %v565_v46  ;;  %v1028_v49 = vadd.f32 %v2124_v40, %v693_v47  ;;  %v1059_v54 = vmax.f32 %v995_v39, 0.0  ;;  %v1091_v55 = vmax.f32 %v1027_v41, 0.0 }
 0x12f   :  { %v1062_v52 = vmax.f32 %v998_v44, 0.0  ;;  %v1094_v53 = vmax.f32 %v1030_v45, 0.0 }
 0x130   :  { %v1060_v56 = vmax.f32 %v996_v48, 0.0  ;;  %v1092_v57 = vmax.f32 %v1028_v49, 0.0 }
 0x131   :  { %v1650_v58 = vpack.c.bf16 %v1062_v52, %v1061_v50  ;;  %v1730_v59 = vpack.c.bf16 %v1094_v53, %v1093_v51 }
 0x132   :  { %v1645_v60 = vpack.c.bf16 %v1060_v56, %v1059_v54  ;;  %v1725_v61 = vpack.c.bf16 %v1092_v57, %v1091_v55  ;;  %v1883_v62 = vpop.f32.mrb[12].mxu0  ;;  %v1915_v63 = vpop.f32.mrb[12].mxu1 }
 0x133   :  { %1786 = vst [vmem:[#allocation8 + $0x28] sm:$0xff] %v1650_v58   ;;  %1802 = vst [vmem:[#allocation8 + $0xa8] sm:$0xff] %v1730_v59   ;;  %v1001_v0 = vadd.f32 %v1883_v62, %v2124_v40  ;;  %v1033_v1 = vadd.f32 %v1915_v63, %v2124_v40  ;;  %v578_v2 = vpop.f32.mrb[13].mxu0  ;;  %v706_v3 = vpop.f32.mrb[13].mxu1 }
 0x134   :  { %1785 = vst [vmem:[#allocation8 + $0x20] sm:$0xff] %v1645_v60   ;;  %1801 = vst [vmem:[#allocation8 + $0xa0] sm:$0xff] %v1725_v61   ;;  %v999_v4 = vadd.f32 %v2124_v40, %v578_v2  ;;  %v1031_v5 = vadd.f32 %v2124_v40, %v706_v3  ;;  %v1884_v6 = vpop.f32.mrb[14].mxu0  ;;  %v1916_v7 = vpop.f32.mrb[14].mxu1 }
 0x135   :  { %v1002_v8 = vadd.f32 %v1884_v6, %v2124_v40  ;;  %v1034_v9 = vadd.f32 %v1916_v7, %v2124_v40  ;;  %v581_v10 = vpop.f32.mrb[15].mxu0  ;;  %v709_v11 = vpop.f32.mrb[15].mxu1  ;;  %v1065_v14 = vmax.f32 %v1001_v0, 0.0  ;;  %v1097_v15 = vmax.f32 %v1033_v1, 0.0 }
 0x136   :  { %v1000_v12 = vadd.f32 %v2124_v40, %v581_v10  ;;  %v1032_v13 = vadd.f32 %v2124_v40, %v709_v11  ;;  %v1063_v18 = vmax.f32 %v999_v4, 0.0  ;;  %v1095_v19 = vmax.f32 %v1031_v5, 0.0 }
 0x137   :  { %v1066_v16 = vmax.f32 %v1002_v8, 0.0  ;;  %v1098_v17 = vmax.f32 %v1034_v9, 0.0 }
 0x138   :  { %v1064_v20 = vmax.f32 %v1000_v12, 0.0  ;;  %v1096_v21 = vmax.f32 %v1032_v13, 0.0 }
 0x139   :  { %v1660_v22 = vpack.c.bf16 %v1066_v16, %v1065_v14  ;;  %v1740_v23 = vpack.c.bf16 %v1098_v17, %v1097_v15 }
 0x13a   :  { %v1655_v24 = vpack.c.bf16 %v1064_v20, %v1063_v18  ;;  %v1735_v25 = vpack.c.bf16 %v1096_v21, %v1095_v19  ;;  %v1887_v26 = vpop.f32.mrb[16].mxu0  ;;  %v1919_v27 = vpop.f32.mrb[16].mxu1 }
 0x13b   :  { %1788 = vst [vmem:[#allocation8 + $0x38] sm:$0xff] %v1660_v22   ;;  %1804 = vst [vmem:[#allocation8 + $0xb8] sm:$0xff] %v1740_v23   ;;  %v1005_v28 = vadd.f32 %v1887_v26, %v2124_v40  ;;  %v1037_v29 = vadd.f32 %v1919_v27, %v2124_v40  ;;  %v594_v30 = vpop.f32.mrb[17].mxu0  ;;  %v722_v31 = vpop.f32.mrb[17].mxu1 }
 0x13c   :  { %1787 = vst [vmem:[#allocation8 + $0x30] sm:$0xff] %v1655_v24   ;;  %1803 = vst [vmem:[#allocation8 + $0xb0] sm:$0xff] %v1735_v25   ;;  %v1003_v32 = vadd.f32 %v2124_v40, %v594_v30  ;;  %v1035_v33 = vadd.f32 %v2124_v40, %v722_v31  ;;  %v1888_v34 = vpop.f32.mrb[18].mxu0  ;;  %v1920_v35 = vpop.f32.mrb[18].mxu1 }
 0x13d   :  { %v1006_v36 = vadd.f32 %v1888_v34, %v2124_v40  ;;  %v1038_v37 = vadd.f32 %v1920_v35, %v2124_v40  ;;  %v597_v38 = vpop.f32.mrb[19].mxu0  ;;  %v725_v39 = vpop.f32.mrb[19].mxu1  ;;  %v1069_v43 = vmax.f32 %v1005_v28, 0.0  ;;  %v1101_v44 = vmax.f32 %v1037_v29, 0.0 }
 0x13e   :  { %v1004_v41 = vadd.f32 %v2124_v40, %v597_v38  ;;  %v1036_v42 = vadd.f32 %v2124_v40, %v725_v39  ;;  %v1067_v47 = vmax.f32 %v1003_v32, 0.0  ;;  %v1099_v48 = vmax.f32 %v1035_v33, 0.0 }
 0x13f   :  { %v1070_v45 = vmax.f32 %v1006_v36, 0.0  ;;  %v1102_v46 = vmax.f32 %v1038_v37, 0.0 }
 0x140   :  { %v1068_v49 = vmax.f32 %v1004_v41, 0.0  ;;  %v1100_v50 = vmax.f32 %v1036_v42, 0.0 }
 0x141   :  { %v1670_v51 = vpack.c.bf16 %v1070_v45, %v1069_v43  ;;  %v1750_v52 = vpack.c.bf16 %v1102_v46, %v1101_v44 }
 0x142   :  { %v1665_v53 = vpack.c.bf16 %v1068_v49, %v1067_v47  ;;  %v1745_v54 = vpack.c.bf16 %v1100_v50, %v1099_v48  ;;  %v1891_v55 = vpop.f32.mrb[20].mxu0  ;;  %v1923_v56 = vpop.f32.mrb[20].mxu1 }
 0x143   :  { %1790 = vst [vmem:[#allocation8 + $0x48] sm:$0xff] %v1670_v51   ;;  %1806 = vst [vmem:[#allocation8 + $0xc8] sm:$0xff] %v1750_v52   ;;  %v1009_v57 = vadd.f32 %v1891_v55, %v2124_v40  ;;  %v1041_v58 = vadd.f32 %v1923_v56, %v2124_v40  ;;  %v610_v59 = vpop.f32.mrb[21].mxu0  ;;  %v738_v60 = vpop.f32.mrb[21].mxu1 }
 0x144   :  { %1789 = vst [vmem:[#allocation8 + $0x40] sm:$0xff] %v1665_v53   ;;  %1805 = vst [vmem:[#allocation8 + $0xc0] sm:$0xff] %v1745_v54   ;;  %v1007_v61 = vadd.f32 %v2124_v40, %v610_v59  ;;  %v1039_v62 = vadd.f32 %v2124_v40, %v738_v60  ;;  %v1892_v63 = vpop.f32.mrb[22].mxu0  ;;  %v1924_v0 = vpop.f32.mrb[22].mxu1 }
 0x145   :  { %v1010_v1 = vadd.f32 %v1892_v63, %v2124_v40  ;;  %v1042_v2 = vadd.f32 %v1924_v0, %v2124_v40  ;;  %v613_v3 = vpop.f32.mrb[23].mxu0  ;;  %v741_v4 = vpop.f32.mrb[23].mxu1  ;;  %v1073_v7 = vmax.f32 %v1009_v57, 0.0  ;;  %v1105_v8 = vmax.f32 %v1041_v58, 0.0 }
 0x146   :  { %v1008_v5 = vadd.f32 %v2124_v40, %v613_v3  ;;  %v1040_v6 = vadd.f32 %v2124_v40, %v741_v4  ;;  %v1071_v11 = vmax.f32 %v1007_v61, 0.0  ;;  %v1103_v12 = vmax.f32 %v1039_v62, 0.0 }
 0x147   :  { %v1074_v9 = vmax.f32 %v1010_v1, 0.0  ;;  %v1106_v10 = vmax.f32 %v1042_v2, 0.0 }
 0x148   :  { %v1072_v13 = vmax.f32 %v1008_v5, 0.0  ;;  %v1104_v14 = vmax.f32 %v1040_v6, 0.0 }
 0x149   :  { %v1680_v15 = vpack.c.bf16 %v1074_v9, %v1073_v7  ;;  %v1760_v16 = vpack.c.bf16 %v1106_v10, %v1105_v8 }
 0x14a   :  { %v1675_v17 = vpack.c.bf16 %v1072_v13, %v1071_v11  ;;  %v1755_v18 = vpack.c.bf16 %v1104_v14, %v1103_v12  ;;  %v1895_v19 = vpop.f32.mrb[24].mxu0  ;;  %v1927_v20 = vpop.f32.mrb[24].mxu1 }
 0x14b   :  { %1792 = vst [vmem:[#allocation8 + $0x58] sm:$0xff] %v1680_v15   ;;  %1808 = vst [vmem:[#allocation8 + $0xd8] sm:$0xff] %v1760_v16   ;;  %v1013_v21 = vadd.f32 %v1895_v19, %v2124_v40  ;;  %v1045_v22 = vadd.f32 %v1927_v20, %v2124_v40  ;;  %v626_v23 = vpop.f32.mrb[25].mxu0  ;;  %v754_v24 = vpop.f32.mrb[25].mxu1 }
 0x14c   :  { %1791 = vst [vmem:[#allocation8 + $0x50] sm:$0xff] %v1675_v17   ;;  %1807 = vst [vmem:[#allocation8 + $0xd0] sm:$0xff] %v1755_v18   ;;  %v1011_v25 = vadd.f32 %v2124_v40, %v626_v23  ;;  %v1043_v26 = vadd.f32 %v2124_v40, %v754_v24  ;;  %v1896_v27 = vpop.f32.mrb[26].mxu0  ;;  %v1928_v28 = vpop.f32.mrb[26].mxu1 }
 0x14d   :  { %v1014_v29 = vadd.f32 %v1896_v27, %v2124_v40  ;;  %v1046_v30 = vadd.f32 %v1928_v28, %v2124_v40  ;;  %v629_v31 = vpop.f32.mrb[27].mxu0  ;;  %v757_v32 = vpop.f32.mrb[27].mxu1  ;;  %v1077_v35 = vmax.f32 %v1013_v21, 0.0  ;;  %v1109_v36 = vmax.f32 %v1045_v22, 0.0 }
 0x14e   :  { %v1012_v33 = vadd.f32 %v2124_v40, %v629_v31  ;;  %v1044_v34 = vadd.f32 %v2124_v40, %v757_v32  ;;  %v1075_v39 = vmax.f32 %v1011_v25, 0.0  ;;  %v1107_v41 = vmax.f32 %v1043_v26, 0.0 }
 0x14f   :  { %v1078_v37 = vmax.f32 %v1014_v29, 0.0  ;;  %v1110_v38 = vmax.f32 %v1046_v30, 0.0 }
 0x150   :  { %v1076_v42 = vmax.f32 %v1012_v33, 0.0  ;;  %v1108_v43 = vmax.f32 %v1044_v34, 0.0 }
 0x151   :  { %v1690_v44 = vpack.c.bf16 %v1078_v37, %v1077_v35  ;;  %v1770_v45 = vpack.c.bf16 %v1110_v38, %v1109_v36 }
 0x152   :  { %v1685_v46 = vpack.c.bf16 %v1076_v42, %v1075_v39  ;;  %v1765_v47 = vpack.c.bf16 %v1108_v43, %v1107_v41  ;;  %v1899_v48 = vpop.f32.mrb[28].mxu0  ;;  %v1931_v49 = vpop.f32.mrb[28].mxu1 }
 0x153   :  { %1794 = vst [vmem:[#allocation8 + $0x68] sm:$0xff] %v1690_v44   ;;  %1810 = vst [vmem:[#allocation8 + $0xe8] sm:$0xff] %v1770_v45   ;;  %v1017_v50 = vadd.f32 %v1899_v48, %v2124_v40  ;;  %v1049_v51 = vadd.f32 %v1931_v49, %v2124_v40  ;;  %v642_v52 = vpop.f32.mrb[29].mxu0  ;;  %v770_v53 = vpop.f32.mrb[29].mxu1 }
 0x154   :  { %1793 = vst [vmem:[#allocation8 + $0x60] sm:$0xff] %v1685_v46   ;;  %1809 = vst [vmem:[#allocation8 + $0xe0] sm:$0xff] %v1765_v47   ;;  %v1015_v54 = vadd.f32 %v2124_v40, %v642_v52  ;;  %v1047_v55 = vadd.f32 %v2124_v40, %v770_v53  ;;  %v1900_v56 = vpop.f32.mrb[30].mxu0  ;;  %v1932_v57 = vpop.f32.mrb[30].mxu1 }
 0x155   :  { %v1018_v58 = vadd.f32 %v1900_v56, %v2124_v40  ;;  %v1050_v59 = vadd.f32 %v1932_v57, %v2124_v40  ;;  %v645_v60 = vpop.f32.mrb[31].mxu0  ;;  %v773_v61 = vpop.f32.mrb[31].mxu1  ;;  %v1081_v0 = vmax.f32 %v1017_v50, 0.0  ;;  %v1113_v1 = vmax.f32 %v1049_v51, 0.0 }
 0x156   :  { %v1016_v62 = vadd.f32 %v2124_v40, %v645_v60  ;;  %v1048_v63 = vadd.f32 %v2124_v40, %v773_v61  ;;  %v1079_v4 = vmax.f32 %v1015_v54, 0.0  ;;  %v1111_v5 = vmax.f32 %v1047_v55, 0.0 }
 0x157   :  { %v1082_v2 = vmax.f32 %v1018_v58, 0.0  ;;  %v1114_v3 = vmax.f32 %v1050_v59, 0.0 }
 0x158   :  { %v1080_v6 = vmax.f32 %v1016_v62, 0.0  ;;  %v1112_v7 = vmax.f32 %v1048_v63, 0.0 }
 0x159   :  { %v1700_v8 = vpack.c.bf16 %v1082_v2, %v1081_v0  ;;  %v1780_v9 = vpack.c.bf16 %v1114_v3, %v1113_v1 }
 0x15a   :  { %v1695_v10 = vpack.c.bf16 %v1080_v6, %v1079_v4  ;;  %v1775_v11 = vpack.c.bf16 %v1112_v7, %v1111_v5 }
 0x15b   :  { %1796 = vst [vmem:[#allocation8 + $0x78] sm:$0xff] %v1700_v8   ;;  %1812 = vst [vmem:[#allocation8 + $0xf8] sm:$0xff] %v1780_v9  }
 0x15c   :  { %1795 = vst [vmem:[#allocation8 + $0x70] sm:$0xff] %v1695_v10   ;;  %1811 = vst [vmem:[#allocation8 + $0xf0] sm:$0xff] %v1775_v11  }
 0x15d   :  { %2049 = shalt.err (!%p2046_p6)
}
 0x15e   :  { %s2050_s15 = scalar_lea.hbm %s2208_s3, 4096 }
 0x15f   :  { %p2051_p7 = scmp.ne.s32.totalorder %s2208_s3, %s2050_s15  ;;  %p2054_p8 = scmp.lt.u32.totalorder %s2050_s15, %s2208_s3 }
 0x161   :  { %p2056_p9 = pnand %p2054_p8, %p2051_p7 }
 0x163   :  { %2059 = shalt.err (!%p2056_p9)
}
 0x164   :  { %1446 = dma.vmem_to_hbm [thread:$0]  %s1441_s11, 4096, %s2208_s3, [#allocation5], %s2067_s22, %s2067_s22, %s2068_s23  }
 0x165   :  { %2064 = dma.done.wait [#allocation5], 4096  }
 0x166   :  { %2065 = vsyncadd [#allocation5], 4294963200 }
 0x167   :  { %1450 = vsyncpa [#allocation4], 1 }
 0x168   :  { %1451 = vsyncpa [#allocation7], 1 }
 0x169   :  { %1452 = vsyncpa [#allocation5], 1 }

</bundles_post_ra>
